<compile_context>
chip_gen: v5e
topology: v5e:2x2
jax: 0.10.0
libtpu: 0.0.40
codegen_flags: <defaults>
</compile_context>

<pallas_src>
import jax
import jax.numpy as jnp
from jax import lax
from jax.experimental import pallas as pl
from jax.experimental.pallas import tpu as pltpu

EPS = 1e-5  # nn.BatchNorm2d default eps


def _vmem_config():
    """Return (vmem_limit_bytes, per-block byte budget) sized from physical VMEM."""
    try:
        phys = int(pltpu.get_tpu_info().vmem_capacity_bytes)
    except Exception:
        phys = 64 << 20  # conservative (v7x-sized) fallback
    # Leave headroom for Mosaic internal scratch and the other live buffers.
    limit = max(32 << 20, min(phys - (16 << 20), 100 << 20))
    # Pass 2 double-buffers x and y blocks (4 blocks) plus elementwise temps;
    # pass 1 holds ~5 block-sized tensors.  limit // 8 keeps headroom while
    # staying well past the measured ~512-lane knee of the tile-size sweep.
    budget = max(4 << 20, min(limit // 8, 16 << 20))
    return limit, budget


def _stats_kernel(x_ref, sum_ref, sumsq_ref):
    # x_ref: (n_tile, C, m_tile).  sum_ref / sumsq_ref: (1, C, 128) per-N-tile
    # accumulator slab, VMEM-resident across the inner (HW-tile) grid axis.
    j = pl.program_id(1)

    @pl.when(j == 0)
    def _():
        sum_ref[...] = jnp.zeros_like(sum_ref)
        sumsq_ref[...] = jnp.zeros_like(sumsq_ref)

    x = x_ref[...].astype(jnp.float32)             # (n_tile, C, m_tile)
    xs = jnp.sum(x, axis=0, keepdims=True)         # (1, C, m_tile) -- VPU adds
    xq = jnp.sum(x * x, axis=0, keepdims=True)     # (1, C, m_tile)

    mt = xs.shape[-1]
    full = mt // 128
    tail = mt - full * 128

    # Unrolled 128-wide lane-slice accumulation: aligned vreg selection +
    # VALU adds only (no reshape relayout, no per-tile XLU lane reduce).
    if full:
        acc_s = sum_ref[...]
        acc_q = sumsq_ref[...]
        for k in range(full):
            sl = slice(k * 128, (k + 1) * 128)
            acc_s += xs[:, :, sl]
            acc_q += xq[:, :, sl]
        sum_ref[...] = acc_s
        sumsq_ref[...] = acc_q
    if tail:
        # Ragged tail (< 128 lanes): one masked partial add per accumulator.
        sum_ref[:, :, :tail] += xs[:, :, full * 128:]
        sumsq_ref[:, :, :tail] += xq[:, :, full * 128:]


def _normalize_kernel(x_ref, scale_ref, shift_ref, o_ref):
    # gamma/beta are pre-folded into per-channel scale/shift:
    #   y = x * scale + shift      (2 VALU ops / element)
    x = x_ref[...].astype(jnp.float32)             # (n_tile, C, m_tile)
    o_ref[...] = (x * scale_ref[...] + shift_ref[...]).astype(o_ref.dtype)


def _fused_kernel(x_ref, gamma_ref, beta_ref, o_ref):
    # Whole x resident in VMEM: batch stats + normalize in one kernel
    # (single HBM read of x, single write of y).
    x = x_ref[...].astype(jnp.float32)             # (N, C, HW)
    n, _, hw = x.shape
    inv_count = 1.0 / (n * hw)
    s = jnp.sum(x, axis=(0, 2), keepdims=True)     # (1, C, 1)
    sq = jnp.sum(x * x, axis=(0, 2), keepdims=True)
    mean = s * inv_count
    var = jnp.maximum(sq * inv_count - mean * mean, 0.0)
    scale = gamma_ref[...] * lax.rsqrt(var + EPS)
    shift = beta_ref[...] - mean * scale
    o_ref[...] = (x * scale + shift).astype(o_ref.dtype)


def _pick_tiles(N, C, HW, itemsize, budget_bytes):
    """Pick (n_tile, m_tile): n_tile | N, m_tile | HW, block bytes near the
    budget.  m_tile is either a multiple of 128 (lane dense) or the full HW
    extent (always a legal block dim; ragged tail handled in-kernel), so
    non-power-of-two feature maps (56x56, 28x28, 14x14, 7x7) still get
    multi-MiB blocks instead of degenerating to ~100-200 KiB."""
    row_bytes = C * itemsize
    if HW * row_bytes <= budget_bytes:
        m_tile = HW
    else:
        max_m = max(128, budget_bytes // row_bytes)
        lane_divs = [d for d in range(128, min(HW, max_m) + 1, 128)
                     if HW % d == 0]
        # TODO(synk): if HW has no 128-multiple divisor and a full row exceeds
        # the budget (pathological shapes), this can overshoot the block
        # budget; a ragged-last-tile + in-kernel masking path would cover it.
        m_tile = max(lane_divs) if lane_divs else HW

    n_tile = 1
    for d in range(N, 0, -1):
        if N % d == 0 and d * C * m_tile * itemsize <= budget_bytes:
            n_tile = d
            break
    return n_tile, m_tile


def my_batch_norm(x, gamma, beta, *, n_tile=None, m_tile=None, allow_fused=True):
    """Training-mode BatchNorm2d forward. x: (N, C, H, W); gamma, beta: (C,)."""
    N, C, H, W = x.shape
    HW = H * W
    count = N * HW
    itemsize = jnp.dtype(x.dtype).itemsize
    vmem_limit, budget = _vmem_config()

    # Free views, no HBM transpose / data movement.
    x3 = x.reshape(N, C, HW)
    gamma3 = gamma.astype(jnp.float32).reshape(1, C, 1)
    beta3 = beta.astype(jnp.float32).reshape(1, C, 1)

    force_tiles = (n_tile is not None) or (m_tile is not None)

    # ---- fused fast path: x (+ f32 working copies) fits in VMEM ----
    if allow_fused and not force_tiles and (N * C * HW * 4) * 6 <= vmem_limit:
        y3 = pl.pallas_call(
            _fused_kernel,
            out_shape=jax.ShapeDtypeStruct((N, C, HW), x.dtype),
            compiler_params=pltpu.CompilerParams(vmem_limit_bytes=vmem_limit),
        )(x3, gamma3, beta3)
        return y3.reshape(N, C, H, W)

    auto_n, auto_m = _pick_tiles(N, C, HW, itemsize, budget)
    n_tile = auto_n if n_tile is None else n_tile
    m_tile = auto_m if m_tile is None else m_tile
    assert N % n_tile == 0 and HW % m_tile == 0

    grid = (N // n_tile, HW // m_tile)

    # ---- pass 1: per-channel sum / sum-of-squares (x streamed once) ----
    sums, sumsqs = pl.pallas_call(
        _stats_kernel,
        out_shape=(
            jax.ShapeDtypeStruct((grid[0], C, 128), jnp.float32),
            jax.ShapeDtypeStruct((grid[0], C, 128), jnp.float32),
        ),
        grid=grid,
        in_specs=[pl.BlockSpec((n_tile, C, m_tile), lambda i, j: (i, 0, j))],
        out_specs=(
            pl.BlockSpec((1, C, 128), lambda i, j: (i, 0, 0)),
            pl.BlockSpec((1, C, 128), lambda i, j: (i, 0, 0)),
        ),
        compiler_params=pltpu.CompilerParams(
            # Per-N-tile accumulator slabs make the N-tile axis safely
            # "parallel" (v7x megacore sharding); HW-tile axis is the in-slab
            # reduction -> "arbitrary".
            dimension_semantics=("parallel", "arbitrary"),
            vmem_limit_bytes=vmem_limit),
        cost_estimate=pl.CostEstimate(
            flops=3 * N * C * HW,
            transcendentals=0,
            bytes_accessed=N * C * HW * itemsize),
    )(x3)

    # Tiny (C,)-sized epilogue in plain JAX: fold slabs + lanes.
    total = jnp.sum(sums, axis=(0, 2))
    total_sq = jnp.sum(sumsqs, axis=(0, 2))
    mean = total / count
    # Biased variance (BatchNorm2d training-mode normalization).
    # TODO(synk): for extremely large N*H*W or ill-conditioned data, switch to
    # shifted/Welford partial sums to avoid E[x^2]-mean^2 cancellation in f32.
    var = jnp.maximum(total_sq / count - mean * mean, 0.0)
    inv_std = lax.rsqrt(var + EPS)
    scale_v = gamma.astype(jnp.float32) * inv_std
    shift_v = beta.astype(jnp.float32) - mean * scale_v
    scale3 = scale_v.reshape(1, C, 1)
    shift3 = shift_v.reshape(1, C, 1)

    # ---- pass 2: elementwise normalize (x read once, y written once) ----
    y3 = pl.pallas_call(
        _normalize_kernel,
        out_shape=jax.ShapeDtypeStruct((N, C, HW), x.dtype),
        grid=grid,
        in_specs=[
            pl.BlockSpec((n_tile, C, m_tile), lambda i, j: (i, 0, j)),
            pl.BlockSpec((1, C, 1), lambda i, j: (0, 0, 0)),  # VMEM-resident
            pl.BlockSpec((1, C, 1), lambda i, j: (0, 0, 0)),  # VMEM-resident
        ],
        out_specs=pl.BlockSpec((n_tile, C, m_tile), lambda i, j: (i, 0, j)),
        compiler_params=pltpu.CompilerParams(
            dimension_semantics=("parallel", "parallel"),
            vmem_limit_bytes=vmem_limit),
        cost_estimate=pl.CostEstimate(
            flops=2 * N * C * HW,
            transcendentals=0,
            bytes_accessed=2 * N * C * HW * itemsize),
    )(x3, scale3, shift3)

    return y3.reshape(N, C, H, W)


def reference_batch_norm(x, gamma, beta):
    mean = jnp.mean(x, axis=(0, 2, 3), keepdims=True)
    var = jnp.mean((x - mean) ** 2, axis=(0, 2, 3), keepdims=True)
    g = gamma.reshape(1, -1, 1, 1)
    b = beta.reshape(1, -1, 1, 1)
    return (x - mean) * lax.rsqrt(var + EPS) * g + b


if __name__ == "__main__":
    key = jax.random.PRNGKey(0)
    N, C, H, W = 2, 4, 16, 16

    x = jax.random.normal(key, (N, C, H, W), dtype=jnp.float32) * 2.0 + 0.5
    # nn.BatchNorm2d(num_channels) init: weight (gamma) = 1, bias (beta) = 0.
    gamma = jnp.ones((C,), dtype=jnp.float32)
    beta = jnp.zeros((C,), dtype=jnp.float32)

    y_ref = reference_batch_norm(x, gamma, beta)

    # Auto path: fused single-kernel at this size.
    y = jax.block_until_ready(my_batch_norm(x, gamma, beta))
    assert y.shape == (N, C, H, W)
    assert jnp.max(jnp.abs(y - y_ref)) < 1e-4, "mismatch vs reference (fused)"

    # Force the two-pass streamed path with a 2x2 grid so the per-slab
    # accumulators, pl.when init and the 128-lane slice fold are exercised.
    y2 = jax.block_until_ready(my_batch_norm(x, gamma, beta, n_tile=1, m_tile=128))
    assert jnp.max(jnp.abs(y2 - y_ref)) < 1e-4, "mismatch vs reference (two-pass)"

    # Ragged H*W (7x7 = 49 lanes) exercising the masked tail accumulation.
    x3 = jax.random.normal(jax.random.PRNGKey(1), (2, 8, 7, 7), dtype=jnp.float32)
    g3 = jnp.ones((8,), jnp.float32)
    b3 = jnp.zeros((8,), jnp.float32)
    y3 = jax.block_until_ready(my_batch_norm(x3, g3, b3, allow_fused=False))
    y3_ref = reference_batch_norm(x3, g3, b3)
    assert jnp.max(jnp.abs(y3 - y3_ref)) < 1e-4, "mismatch vs reference (ragged HW)"

    print("KERNEL_OK")
</pallas_src>

<mosaic_0001>
module attributes {stable_mosaic.version = 11 : i64} {
  func.func @_fused_kernel(%arg0: memref<2x4x256xf32, #tpu.memory_space<vmem>>, %arg1: memref<1x4x1xf32, #tpu.memory_space<vmem>>, %arg2: memref<1x4x1xf32, #tpu.memory_space<vmem>>, %arg3: memref<2x4x256xf32, #tpu.memory_space<vmem>>) attributes {dimension_semantics = [], scalar_prefetch = 0 : i64, scratch_operands = 0 : i64, tpu.core_type = #tpu.core_type<tc>} {
    %c0 = arith.constant 0 : index
    %c0_0 = arith.constant 0 : index
    %c0_1 = arith.constant 0 : index
    %0 = vector.load %arg0[%c0, %c0_0, %c0_1] : memref<2x4x256xf32, #tpu.memory_space<vmem>>, vector<2x4x256xf32>
    %cst = arith.constant dense<0.000000e+00> : vector<4xf32>
    %1 = vector.multi_reduction <add>, %0, %cst [0, 2] : vector<2x4x256xf32> to vector<4xf32>
    %2 = vector.shape_cast %1 : vector<4xf32> to vector<1x4x1xf32>
    %3 = arith.mulf %0, %0 : vector<2x4x256xf32>
    %cst_2 = arith.constant dense<0.000000e+00> : vector<4xf32>
    %4 = vector.multi_reduction <add>, %3, %cst_2 [0, 2] : vector<2x4x256xf32> to vector<4xf32>
    %5 = vector.shape_cast %4 : vector<4xf32> to vector<1x4x1xf32>
    %cst_3 = arith.constant 0.001953125 : f32
    %6 = vector.broadcast %cst_3 : f32 to vector<1x4x1xf32>
    %7 = arith.mulf %2, %6 : vector<1x4x1xf32>
    %cst_4 = arith.constant 0.001953125 : f32
    %8 = vector.broadcast %cst_4 : f32 to vector<1x4x1xf32>
    %9 = arith.mulf %5, %8 : vector<1x4x1xf32>
    %10 = arith.mulf %7, %7 : vector<1x4x1xf32>
    %11 = arith.subf %9, %10 : vector<1x4x1xf32>
    %cst_5 = arith.constant 0.000000e+00 : f32
    %12 = vector.broadcast %cst_5 : f32 to vector<1x4x1xf32>
    %13 = arith.maximumf %11, %12 : vector<1x4x1xf32>
    %c0_6 = arith.constant 0 : index
    %c0_7 = arith.constant 0 : index
    %c0_8 = arith.constant 0 : index
    %14 = vector.load %arg1[%c0_6, %c0_7, %c0_8] : memref<1x4x1xf32, #tpu.memory_space<vmem>>, vector<1x4x1xf32>
    %cst_9 = arith.constant 9.99999974E-6 : f32
    %15 = vector.broadcast %cst_9 : f32 to vector<1x4x1xf32>
    %16 = arith.addf %13, %15 : vector<1x4x1xf32>
    %17 = math.rsqrt %16 : vector<1x4x1xf32>
    %18 = arith.mulf %14, %17 : vector<1x4x1xf32>
    %c0_10 = arith.constant 0 : index
    %c0_11 = arith.constant 0 : index
    %c0_12 = arith.constant 0 : index
    %19 = vector.load %arg2[%c0_10, %c0_11, %c0_12] : memref<1x4x1xf32, #tpu.memory_space<vmem>>, vector<1x4x1xf32>
    %20 = arith.mulf %7, %18 : vector<1x4x1xf32>
    %21 = arith.subf %19, %20 : vector<1x4x1xf32>
    %22 = vector.broadcast %18 : vector<1x4x1xf32> to vector<2x4x256xf32>
    %23 = arith.mulf %0, %22 : vector<2x4x256xf32>
    %24 = vector.broadcast %21 : vector<1x4x1xf32> to vector<2x4x256xf32>
    %25 = arith.addf %23, %24 : vector<2x4x256xf32>
    %c0_13 = arith.constant 0 : index
    %c0_14 = arith.constant 0 : index
    %c0_15 = arith.constant 0 : index
    %26 = vector.load %arg3[%c0_13, %c0_14, %c0_15] : memref<2x4x256xf32, #tpu.memory_space<vmem>>, vector<2x4x256xf32>
    tpu.vector_store %arg3[%c0_13, %c0_14, %c0_15], %25 {strides = array<i32>} : memref<2x4x256xf32, #tpu.memory_space<vmem>>, vector<2x4x256xf32>,
    return
  }
}

</mosaic_0001>

<bundles_post_ra>
// kernel: tpu_custom_call.1
= control target key start
LH: loop header
LB: loop body
LE: loop exit
PB: predicated region body
PF: predicated region fallthrough
CT: control target
= control target key end

     0   :  { %8 = vsyncpa [#allocation3], 0  ;;  %s270_s0 = inlined_call_operand.hbm [shape: f32[2,4,256], index: 0, kind: input, shape index: {}]   ;;  %s271_s1 = inlined_call_operand.vmem [shape: f32[1,4,1], index: 1, kind: input, shape index: {}]   ;;  %s272_s2 = inlined_call_operand.vmem [shape: f32[1,4,1], index: 2, kind: input, shape index: {}]   ;;  %s273_s3 = inlined_call_operand.hbm [shape: f32[2,4,256], index: 3, kind: output, shape index: {}]  }
   0x1   :  { %9 = vsyncpa [#allocation4], 0  ;;  %s14_s14 = sshll.u32 %s270_s0, 4  ;;  %s206_s15 = smov [#allocation2]   ;;  %s15_s14 = int_to_ptr.hbm [resolvable:$true] %s14_s14 }
   0x2   :  { %s16_s16 = sshll.u32 %s206_s15, 4  ;;  %s207_s17 = smov 128   ;;  %s17_s16 = int_to_ptr.vmem [resolvable:$true] %s16_s16 }
   0x3   :  { %s208_s18 = smov 8  }
   0x4   :  { %22 = dma.hbm_to_vmem [thread:$0]  %s15_s14, 256, %s17_s16, [#allocation3], %s207_s17, %s207_s17, %s208_s18  }
   0x5   :  { %202 = dma.done.wait [#allocation3], 256  }
   0x6   :  { %203 = vsyncadd [#allocation3], 4294967040  ;;  %v238_v0 = vld [vmem:[#allocation2] sm:$0xff]  ;;  %v240_v1 = vld [vmem:[#allocation2 + $0x8] sm:$0xff]  ;;  %vm46_vm0 = vcmask 1043456   ;;  %v209_v26 = vmov 0  }
   0x7   :  { %35 = vst [vmem:[#allocation1] ss:$2 sm:$0xff] %v238_v0  ;;  %v56_v2 = vmul.f32 %v238_v0, %v238_v0  ;;  %v57_v3 = vmul.f32 %v240_v1, %v240_v1  ;;  %150 = vset.pattern.permute.xlu1 %v209_v26  ;;  %151 = vset.pattern.permute.xlu0 %v209_v26  ;;  %v85_v40 = vld [vmem:[%s271_s1] sm:$0xf]  ;;  %v210_v47 = vmov 839922192  }
   0x8   :  { %39 = vst [vmem:[#allocation1 + $0x10] ss:$2 sm:$0xff] %v240_v1  ;;  %v98_v45 = vld [vmem:[%s272_s2] sm:$0xf]  ;;  %v106_v48 = vunpack.c.l.s4 %v210_v47  ;;  %s211_s1 = smov [#allocation5]   ;;  %s131_s25 = sshll.u32 %s273_s3, 4  ;;  %s132_s25 = int_to_ptr.hbm [resolvable:$true] %s131_s25 }
   0x9   :  { %s129_s22 = sshll.u32 %s211_s1, 4  ;;  %s130_s22 = int_to_ptr.vmem [resolvable:$true] %s129_s22 }
   0xa   :  { %v107_v50 = vunpack.c.0.s8 %v106_v48 }
   0xe   :  { %v36_v4 = vld.sshfl [vmem:[#allocation1] sm:$0xff pattern:$0x75316420]  ;;  %v37_v5 = vld.sshfl [vmem:[#allocation1 + $0x8] sm:$0xff pattern:$0x75316420] }
   0xf   :  { %v40_v6 = vld.sshfl [vmem:[#allocation1 + $0x10] sm:$0xff pattern:$0x75316420]  ;;  %v41_v7 = vld.sshfl [vmem:[#allocation1 + $0x18] sm:$0xff pattern:$0x75316420] }
  0x10   :  { %v47_v8 = vsel %vm46_vm0, %v36_v4, 0.0  ;;  %v48_v9 = vsel %vm46_vm0, %v37_v5, 0.0  ;;  %v50_v10 = vsel %vm46_vm0, %v40_v6, 0.0  ;;  %60 = vst [vmem:[#allocation1] ss:$2 sm:$0xff] %v56_v2  ;;  %v52_v12 = vsel %vm46_vm0, %v41_v7, 0.0 }
  0x11   :  { %v49_v11 = vadd.f32 %v48_v9, %v47_v8  ;;  %64 = vst [vmem:[#allocation1 + $0x10] ss:$2 sm:$0xff] %v57_v3 }
  0x13   :  { %v51_v13 = vadd.f32 %v50_v10, %v49_v11 }
  0x15   :  { %v53_v14 = vadd.f32 %v52_v12, %v51_v13 }
  0x17   :  { %54 = vadd.xlane.f32.xlu0 %v53_v14  ;;  %v61_v15 = vld.sshfl [vmem:[#allocation1] sm:$0xff pattern:$0x75316420]  ;;  %v62_v16 = vld.sshfl [vmem:[#allocation1 + $0x8] sm:$0xff pattern:$0x75316420] }
  0x18   :  { %v65_v17 = vld.sshfl [vmem:[#allocation1 + $0x10] sm:$0xff pattern:$0x75316420]  ;;  %v66_v18 = vld.sshfl [vmem:[#allocation1 + $0x18] sm:$0xff pattern:$0x75316420] }
  0x19   :  { %v71_v19 = vsel %vm46_vm0, %v61_v15, 0.0  ;;  %v72_v20 = vsel %vm46_vm0, %v62_v16, 0.0  ;;  %v74_v21 = vsel %vm46_vm0, %v65_v17, 0.0  ;;  %v76_v23 = vsel %vm46_vm0, %v66_v18, 0.0 }
  0x1a   :  { %v73_v22 = vadd.f32 %v72_v20, %v71_v19 }
  0x1c   :  { %v75_v24 = vadd.f32 %v74_v21, %v73_v22 }
  0x1e   :  { %v77_v25 = vadd.f32 %v76_v23, %v75_v24 }
  0x20   :  { %78 = vadd.xlane.f32.xlu0 %v77_v25 }
  0x8a   :  { %v55_v27 = vpop.xlane.xlu0 %54 }
  0x8b   :  { %v80_v28 = vmul.f32 0.001953125, %v55_v27 }
  0x8d   :  { %v82_v30 = vmul.f32 %v80_v28, %v80_v28 }
  0x93   :  { %v79_v29 = vpop.xlane.xlu0 %78 }
  0x94   :  { %v81_v31 = vmul.f32 0.001953125, %v79_v29 }
  0x96   :  { %v83_v32 = vsub.f32 %v81_v31, %v82_v30 }
  0x98   :  { %v84_v33 = vmax.f32 %v83_v32, 0.0 }
  0x9a   :  { %v86_v34 = vadd.f32 1e-05, %v84_v33 }
  0x9c   :  { %152 = vrsqrt.f32 %v86_v34  ;;  %vm93_vm2 = vweird.f32 %v86_v34 }
  0xa2   :  { %v153_v35 = vpop.eup %152 }
  0xa3   :  { %v88_v36 = vmul.f32 %v153_v35, %v86_v34  ;;  %vm94_vm1 = vweird.f32 %v153_v35 }
  0xa4   :  { %vm95_vm3 = vmor %vm93_vm2, %vm94_vm1 }
  0xa5   :  { %v89_v37 = vmul.f32 %v153_v35, %v88_v36 }
  0xa7   :  { %v90_v38 = vmul.f32 0.5, %v89_v37 }
  0xa9   :  { %v91_v39 = vsub.f32 1.5, %v90_v38 }
  0xab   :  { %v92_v41 = vmul.f32 %v153_v35, %v91_v39 }
  0xad   :  { %v96_v42 = vsel %vm95_vm3, %v153_v35, %v92_v41 }
  0xae   :  { %v97_v43 = vmul.f32 %v96_v42, %v85_v40 }
  0xb0   :  { %103 = vperm.xlu1 %150, %v97_v43   ;;  %v99_v44 = vmul.f32 %v97_v43, %v80_v28 }
  0xb2   :  { %v100_v46 = vsub.f32 %v98_v45, %v99_v44 }
  0xb8   :  { %114 = vperm.xlu1 %150, %v100_v46  }
 0x122   :  { %v104_v49 = vpop.permute.xlu1 %103 }
 0x123   :  { %v108_v51 = vperm.slane %v104_v49, %v107_v50 }
 0x125   :  { %v110_v53 = vmul.f32 %v108_v51, %v238_v0  ;;  %v111_v54 = vmul.f32 %v108_v51, %v240_v1 }
 0x12a   :  { %v115_v52 = vpop.permute.xlu1 %114 }
 0x12b   :  { %v119_v55 = vperm.slane %v115_v52, %v107_v50 }
 0x12d   :  { %v121_v56 = vadd.f32 %v119_v55, %v110_v53  ;;  %v122_v57 = vadd.f32 %v119_v55, %v111_v54 }
 0x12f   :  { %123 = vst [vmem:[#allocation5] sm:$0xff] %v121_v56 }
 0x130   :  { %124 = vst [vmem:[#allocation5 + $0x8] sm:$0xff] %v122_v57 }
 0x131   :  { %137 = dma.vmem_to_hbm [thread:$0]  %s130_s22, 256, %s132_s25, [#allocation4], %s207_s17, %s207_s17, %s208_s18  }
 0x132   :  { %204 = dma.done.wait [#allocation4], 256  }
 0x133   :  { %205 = vsyncadd [#allocation4], 4294967040 }
 0x134   :  { %142 = vsyncpa [#allocation3], 1 }
 0x135   :  { %143 = vsyncpa [#allocation4], 1 }

</bundles_post_ra>
